<compile_context>
chip_gen: v6e
topology: v6e:2x2x1
jax: 0.10.0
libtpu: 0.0.40
codegen_flags: <defaults>
</compile_context>

<pallas_src>
import functools
import math

import jax
import jax.numpy as jnp
from jax import lax
from jax.experimental import pallas as pl
from jax.experimental.pallas import tpu as pltpu


_NEG_INF = -1e30  # finite "-inf": keeps max()/exp() NaN-free for masked rows


@functools.lru_cache(maxsize=None)
def _vmem_limit_bytes():
    """Generation-aware VMEM budget (leave headroom for compiler scratch)."""
    try:
        cap = getattr(pltpu.get_tpu_info(), "vmem_capacity_bytes", None)
        if cap:
            # ~75% of physical VMEM, capped at 100 MiB: ~96-100 MiB on
            # v5e/v6e (128 MiB phys), ~48 MiB on v7x (64 MiB phys).
            return int(min(100 * 1024 * 1024, cap * 3 // 4))
    except Exception:
        pass
    return 64 * 1024 * 1024


def _compiler_params(dimension_semantics):
    return pltpu.CompilerParams(dimension_semantics=dimension_semantics,
                                vmem_limit_bytes=_vmem_limit_bytes())


def _pick_tile(n, candidates):
    """Largest candidate dividing n, else the full extent (always legal)."""
    for c in candidates:
        if c <= n and n % c == 0:
            return c
    return n


# ---------------------------------------------------------------------------
# 1/4) Tiled matmul kernel (linear projections, no bias): y = x @ w_t
# ---------------------------------------------------------------------------
def _matmul_kernel(x_ref, w_ref, o_ref, acc_ref):
    @pl.when(pl.program_id(2) == 0)
    def _():
        acc_ref[...] = jnp.zeros_like(acc_ref)

    # Operands keep their input dtype (bf16 inputs -> bf16 MXU passes);
    # accumulation is always f32.
    acc_ref[...] += jnp.dot(x_ref[...], w_ref[...],
                            preferred_element_type=jnp.float32)

    @pl.when(pl.program_id(2) == pl.num_programs(2) - 1)
    def _():
        o_ref[...] = acc_ref[...].astype(o_ref.dtype)


def linear(x2d, w_t, *, out_dtype=None):
    """x2d: (M, K), w_t: (K, N) -> (M, N) with f32 accumulation."""
    M, K = x2d.shape
    K2, N = w_t.shape
    assert K == K2
    out_dtype = out_dtype or x2d.dtype
    # Large lane-dense tiles (v6e sweet spot); still 128-multiples for v5e.
    tm = _pick_tile(M, (1024, 512, 256, 128))
    tn = _pick_tile(N, (1024, 512, 256, 128))
    tk = _pick_tile(K, (512, 256, 128))
    return pl.pallas_call(
        _matmul_kernel,
        out_shape=jax.ShapeDtypeStruct((M, N), out_dtype),
        grid_spec=pltpu.PrefetchScalarGridSpec(
            num_scalar_prefetch=0,
            grid=(M // tm, N // tn, K // tk),
            in_specs=[
                pl.BlockSpec((tm, tk), lambda i, j, k: (i, k)),
                pl.BlockSpec((tk, tn), lambda i, j, k: (k, j)),
            ],
            out_specs=pl.BlockSpec((tm, tn), lambda i, j, k: (i, j)),
            scratch_shapes=[pltpu.VMEM((tm, tn), jnp.float32)],
        ),
        compiler_params=_compiler_params(("parallel", "parallel", "arbitrary")),
    )(x2d, w_t)


# ---------------------------------------------------------------------------
# 2) Fused RoPE kernel: one pass over the whole qkv activation.
#    q/k heads (head index < n_rot_heads) get the interleaved rotation,
#    v heads pass through.  cos/sin are (S, D) and broadcast across heads
#    in-kernel; the even/odd pair swap is a lane-neighbour swizzle.
# ---------------------------------------------------------------------------
def _rope_kernel(x_ref, cos_ref, sin_ref, o_ref, *, n_rot_heads):
    x = x_ref[...].astype(jnp.float32)          # (ts, Htot, D), interleaved
    c = cos_ref[...][:, None, :]                # (ts, 1, D) -> bcast over heads
    s = sin_ref[...][:, None, :]

    lane = lax.broadcasted_iota(jnp.int32, x.shape, 2)
    is_odd = (lane & 1) == 1
    # Pairwise swap along the lane dim: swap[2i] = x[2i+1], swap[2i+1] = x[2i].
    # The neighbour access never crosses a pair boundary, so the circular
    # wrap of the roll is never selected.
    x_swap = jnp.where(is_odd,
                       jnp.roll(x, 1, axis=2),
                       jnp.roll(x, -1, axis=2))
    sgn = jnp.where(is_odd, jnp.float32(1.0), jnp.float32(-1.0))
    rotated = x * c + x_swap * (sgn * s)

    head = lax.broadcasted_iota(jnp.int32, x.shape, 1)
    o_ref[...] = jnp.where(head < n_rot_heads, rotated, x).astype(o_ref.dtype)


def rope_qkv(qkv, cos, sin, *, n_rot_heads):
    """qkv: (B, S, Htot, D) with interleaved (real, imag) pairs on the last
    axis.  cos/sin: (S, D//2) f32.  Heads [0, n_rot_heads) are rotated."""
    B, S, Htot, D = qkv.shape
    # Interleave once to width D (tiny (S, D) tables, NOT tiled by heads).
    cos_il = jnp.repeat(cos.astype(jnp.float32), 2, axis=-1)   # (S, D)
    sin_il = jnp.repeat(sin.astype(jnp.float32), 2, axis=-1)

    ts = _pick_tile(S, (256, 128, 64, 32, 16, 8))
    kernel = functools.partial(_rope_kernel, n_rot_heads=n_rot_heads)
    return pl.pallas_call(
        kernel,
        out_shape=jax.ShapeDtypeStruct(qkv.shape, qkv.dtype),
        grid_spec=pltpu.PrefetchScalarGridSpec(
            num_scalar_prefetch=0,
            grid=(B, S // ts),
            in_specs=[
                pl.BlockSpec((None, ts, Htot, D), lambda b, si: (b, si, 0, 0)),
                pl.BlockSpec((ts, D), lambda b, si: (si, 0)),
                pl.BlockSpec((ts, D), lambda b, si: (si, 0)),
            ],
            out_specs=pl.BlockSpec((None, ts, Htot, D),
                                   lambda b, si: (b, si, 0, 0)),
        ),
        compiler_params=_compiler_params(("parallel", "parallel")),
    )(qkv, cos_il, sin_il)


# ---------------------------------------------------------------------------
# 3) Attention core: flash-style online softmax.
#    q:      (B, Hkv, G, D)  with G = S * n_rep (query heads grouped by KV
#            head, so each K/V block is read once per group)
#    k, v:   (B, Hkv, max_seq, D) KV caches (native layout, no transpose)
#    out:    (B, Hkv, G, D)
#    Causal + kv-length masking is generated in-kernel.
# ---------------------------------------------------------------------------
def _attention_kernel(q_ref, k_ref, v_ref, o_ref, m_sc, l_sc, acc_sc, *,
                      scale, n_rep, tq, tkv, start_pos, kv_len, causal):
    qi = pl.program_id(2)
    ki = pl.program_id(3)

    @pl.when(ki == 0)
    def _():
        m_sc[...] = jnp.full_like(m_sc, _NEG_INF)
        l_sc[...] = jnp.zeros_like(l_sc)
        acc_sc[...] = jnp.zeros_like(acc_sc)

    def compute():
        q = q_ref[...]                           # (tg, D), input dtype
        k = k_ref[...]                           # (tkv, D)
        s = lax.dot_general(q, k, (((1,), (1,)), ((), ())),
                            preferred_element_type=jnp.float32) * scale

        # In-kernel mask: row r covers query seq index (qi*tq + r // n_rep);
        # the causal test is written multiplicatively to avoid int division.
        row = lax.broadcasted_iota(jnp.int32, s.shape, 0)
        col = lax.broadcasted_iota(jnp.int32, s.shape, 1)
        k_pos = ki * tkv + col
        valid = k_pos < kv_len
        if causal:
            valid = jnp.logical_and(
                valid, k_pos * n_rep <= row + (start_pos + qi * tq) * n_rep)
        s = jnp.where(valid, s, _NEG_INF)

        m_prev = m_sc[...]
        m_new = jnp.maximum(m_prev, s.max(axis=-1, keepdims=True))
        alpha = jnp.exp(m_prev - m_new)
        p = jnp.exp(s - m_new)
        p = jnp.where(valid, p, 0.0)             # NaN-proof for fully masked rows
        l_sc[...] = alpha * l_sc[...] + p.sum(axis=-1, keepdims=True)
        acc_sc[...] = alpha * acc_sc[...] + jnp.dot(
            p.astype(v_ref.dtype), v_ref[...],
            preferred_element_type=jnp.float32)
        m_sc[...] = m_new

    if causal:
        # Skip KV blocks that are entirely above the diagonal for this q tile.
        q_last_pos = start_pos + (qi + 1) * tq - 1
        pl.when(ki * tkv <= q_last_pos)(compute)
    else:
        compute()

    @pl.when(ki == pl.num_programs(3) - 1)
    def _():
        l = l_sc[...]
        l_safe = jnp.where(l > 0.0, l, 1.0)      # fully-masked rows -> output 0
        o_ref[...] = (acc_sc[...] *
                      pl.reciprocal(l_safe, approx=True)).astype(o_ref.dtype)


def attention_core(q, k_cache, v_cache, *, kv_len, start_pos, n_rep, scale,
                   causal):
    B, Hkv, G, D = q.shape
    _, _, max_seq, _ = k_cache.shape

    # Query-row tile (tg rows = tq seq positions x n_rep grouped heads).
    tg = _pick_tile(G, (512, 256, 128))
    if tg % n_rep != 0:
        tg = G
    tq = tg // n_rep
    # KV tile must divide max_seq so the cdiv grid never reads out of bounds;
    # columns >= kv_len are masked in-kernel.
    tkv = _pick_tile(max_seq, (512, 256, 128))
    nkv = (kv_len + tkv - 1) // tkv

    kernel = functools.partial(
        _attention_kernel, scale=scale, n_rep=n_rep, tq=tq, tkv=tkv,
        start_pos=start_pos, kv_len=kv_len, causal=causal)

    return pl.pallas_call(
        kernel,
        out_shape=jax.ShapeDtypeStruct((B, Hkv, G, D), q.dtype),
        grid_spec=pltpu.PrefetchScalarGridSpec(
            num_scalar_prefetch=0,
            grid=(B, Hkv, G // tg, nkv),
            in_specs=[
                pl.BlockSpec((None, None, tg, D),
                             lambda b, h, qi, ki: (b, h, qi, 0)),
                pl.BlockSpec((None, None, tkv, D),
                             lambda b, h, qi, ki: (b, h, ki, 0)),
                pl.BlockSpec((None, None, tkv, D),
                             lambda b, h, qi, ki: (b, h, ki, 0)),
            ],
            out_specs=pl.BlockSpec((None, None, tg, D),
                                   lambda b, h, qi, ki: (b, h, qi, 0)),
            scratch_shapes=[
                pltpu.VMEM((tg, 1), jnp.float32),
                pltpu.VMEM((tg, 1), jnp.float32),
                pltpu.VMEM((tg, D), jnp.float32),
            ],
        ),
        compiler_params=_compiler_params(
            ("parallel", "parallel", "parallel", "arbitrary")),
    )(q, k_cache, v_cache)


# ---------------------------------------------------------------------------
# Full Attention.forward (functional)
# ---------------------------------------------------------------------------
def attention_forward(x, fused_params, cache_k, cache_v, start_pos, cos, sin,
                      *, n_heads, n_kv_heads, causal=True):
    """Functional equivalent of llama3 Attention.forward.

    x: (B, S, dim).  fused_params: wqkv_t (dim, (H+2*Hkv)*D) and
    wo_t (H*D, dim), pre-fused/pre-transposed once at init.
    cache_k/cache_v: (B, Hkv, max_seq_len, D) -- note the head-major cache
    layout so the attention kernel reads lane-dense tiles directly.
    cos/sin: (S, D//2) rotary tables for positions [start_pos, start_pos+S).
    causal=True generates the llama causal mask in-kernel (matches the
    module's mask for prefill and mask=None for single-token decode).
    Returns (output, new_cache_k, new_cache_v).
    """
    # TODO(synk): arbitrary user-supplied additive masks are not plumbed; the
    # llama causal / None masks are generated in-kernel instead.
    B, S, dim = x.shape
    H, Hkv = n_heads, n_kv_heads
    D = dim // H
    n_rep = H // Hkv
    Htot = H + 2 * Hkv

    # 1) fused QKV projection.
    qkv = linear(x.reshape(B * S, dim), fused_params["wqkv_t"])   # (B*S, Htot*D)

    # 2) RoPE on q and k heads in one kernel (v passes through).
    qkv = rope_qkv(qkv.reshape(B, S, Htot, D), cos, sin, n_rot_heads=H + Hkv)

    xq = qkv[:, :, :H]                        # (B, S, H, D)
    xk = qkv[:, :, H:H + Hkv]                 # (B, S, Hkv, D)
    xv = qkv[:, :, H + Hkv:]                  # (B, S, Hkv, D)

    # 3) KV-cache update (cache kept in (B, Hkv, max_seq, D): only the new
    # S tokens are transposed, never the whole cache).
    xk_t = jnp.transpose(xk, (0, 2, 1, 3)).astype(cache_k.dtype)
    xv_t = jnp.transpose(xv, (0, 2, 1, 3)).astype(cache_v.dtype)
    cache_k = lax.dynamic_update_slice(cache_k, xk_t, (0, 0, start_pos, 0))
    cache_v = lax.dynamic_update_slice(cache_v, xv_t, (0, 0, start_pos, 0))
    kv_len = start_pos + S

    # 4) Group query heads by KV head: (B, Hkv, S*n_rep, D).
    q_g = jnp.transpose(xq.reshape(B, S, Hkv, n_rep, D), (0, 2, 1, 3, 4))
    q_g = q_g.reshape(B, Hkv, S * n_rep, D)

    o = attention_core(q_g, cache_k, cache_v, kv_len=kv_len,
                       start_pos=start_pos, n_rep=n_rep,
                       scale=1.0 / math.sqrt(D), causal=causal)

    # 5) back to (B*S, H*D) and output projection.
    o = jnp.transpose(o.reshape(B, Hkv, S, n_rep, D), (0, 2, 1, 3, 4))
    o = o.reshape(B * S, H * D)
    out = linear(o, fused_params["wo_t"]).reshape(B, S, dim)
    return out, cache_k, cache_v


# ---------------------------------------------------------------------------
# Pure-JAX reference (mirrors the PyTorch code exactly) for correctness check
# ---------------------------------------------------------------------------
def _reference_forward(x, params, cache_k, cache_v, start_pos, cos, sin, mask,
                       *, n_heads, n_kv_heads):
    B, S, dim = x.shape
    H, Hkv = n_heads, n_kv_heads
    D = dim // H
    xq = (x @ params["wq"].T).reshape(B, S, H, D)
    xk = (x @ params["wk"].T).reshape(B, S, Hkv, D)
    xv = (x @ params["wv"].T).reshape(B, S, Hkv, D)

    def rope(t):
        te = t[..., 0::2].astype(jnp.float32)
        to = t[..., 1::2].astype(jnp.float32)
        c = cos[None, :, None, :]
        s = sin[None, :, None, :]
        re = te * c - to * s
        im = te * s + to * c
        return jnp.stack([re, im], axis=-1).reshape(t.shape).astype(t.dtype)

    xq, xk = rope(xq), rope(xk)
    cache_k = lax.dynamic_update_slice(cache_k, xk, (0, start_pos, 0, 0))
    cache_v = lax.dynamic_update_slice(cache_v, xv, (0, start_pos, 0, 0))
    kv_len = start_pos + S
    keys, values = cache_k[:, :kv_len], cache_v[:, :kv_len]
    if Hkv < H:
        keys = jnp.repeat(keys, H // Hkv, axis=2)
        values = jnp.repeat(values, H // Hkv, axis=2)
    q = jnp.transpose(xq, (0, 2, 1, 3))
    k = jnp.transpose(keys, (0, 2, 1, 3))
    v = jnp.transpose(values, (0, 2, 1, 3))
    scores = jnp.einsum("bhqd,bhkd->bhqk", q, k) / math.sqrt(D)
    if mask is not None:
        scores = scores + mask
    probs = jax.nn.softmax(scores.astype(jnp.float32), -1).astype(q.dtype)
    out = jnp.einsum("bhqk,bhkd->bhqd", probs, v)
    out = jnp.transpose(out, (0, 2, 1, 3)).reshape(B, S, H * D)
    return out @ params["wo"].T, cache_k, cache_v


if __name__ == "__main__":
    # Small shapes consistent with the module: dim=32, 4 heads (head_dim=8),
    # 2 kv-heads (GQA n_rep=2), batch=2, prefill seq=8 then one decode step.
    batch, seq, dim = 2, 8, 32
    n_heads, n_kv_heads = 4, 2
    head_dim = dim // n_heads
    max_seq_len = 16
    rope_theta = 500000.0

    key = jax.random.PRNGKey(0)
    kx1, kx2, kq, kk, kv2, ko = jax.random.split(key, 6)
    x_prefill = jax.random.normal(kx1, (batch, seq, dim), dtype=jnp.float32)
    x_decode = jax.random.normal(kx2, (batch, 1, dim), dtype=jnp.float32)

    wq = 0.05 * jax.random.normal(kq, (n_heads * head_dim, dim), jnp.float32)
    wk = 0.05 * jax.random.normal(kk, (n_kv_heads * head_dim, dim), jnp.float32)
    wv = 0.05 * jax.random.normal(kv2, (n_kv_heads * head_dim, dim), jnp.float32)
    wo = 0.05 * jax.random.normal(ko, (dim, n_heads * head_dim), jnp.float32)
    params = {"wq": wq, "wk": wk, "wv": wv, "wo": wo}
    # Pre-fused / pre-transposed projection weights, built once at init.
    fused = {
        "wqkv_t": jnp.concatenate([wq.T, wk.T, wv.T], axis=1),
        "wo_t": wo.T,
    }

    # Pallas-side KV cache in (B, Hkv, max_seq, D); reference keeps the
    # PyTorch (B, max_seq, Hkv, D) layout.
    cache_k = jnp.zeros((batch, n_kv_heads, max_seq_len, head_dim), jnp.float32)
    cache_v = jnp.zeros_like(cache_k)
    ref_ck = jnp.zeros((batch, max_seq_len, n_kv_heads, head_dim), jnp.float32)
    ref_cv = jnp.zeros_like(ref_ck)

    inv_freq = 1.0 / (rope_theta ** (
        jnp.arange(0, head_dim, 2, dtype=jnp.float32) / head_dim))

    def rope_tables(start, length):
        t = jnp.arange(start, start + length, dtype=jnp.float32)
        ang = jnp.outer(t, inv_freq)                 # (length, head_dim // 2)
        return jnp.cos(ang), jnp.sin(ang)

    def check(out, ref, tag):
        err = float(jnp.max(jnp.abs(out - ref)))
        assert out.shape == ref.shape and err < 2e-3, (tag, err)

    # ---- step 1: prefill (start_pos=0, seq=8, causal mask) ----
    cos, sin = rope_tables(0, seq)
    out, cache_k, cache_v = attention_forward(
        x_prefill, fused, cache_k, cache_v, 0, cos, sin,
        n_heads=n_heads, n_kv_heads=n_kv_heads, causal=True)
    out = jax.block_until_ready(out)

    causal_mask = jnp.triu(jnp.full((seq, seq), -jnp.inf, jnp.float32), k=1)
    ref_out, ref_ck, ref_cv = _reference_forward(
        x_prefill, params, ref_ck, ref_cv, 0, cos, sin, causal_mask,
        n_heads=n_heads, n_kv_heads=n_kv_heads)
    check(out, ref_out, "prefill")

    # ---- step 2: decode (start_pos=8, seq=1, module passes mask=None) ----
    cos1, sin1 = rope_tables(seq, 1)
    out1, cache_k, cache_v = attention_forward(
        x_decode, fused, cache_k, cache_v, seq, cos1, sin1,
        n_heads=n_heads, n_kv_heads=n_kv_heads, causal=True)
    out1 = jax.block_until_ready(out1)

    ref_out1, ref_ck, ref_cv = _reference_forward(
        x_decode, params, ref_ck, ref_cv, seq, cos1, sin1, None,
        n_heads=n_heads, n_kv_heads=n_kv_heads)
    check(out1, ref_out1, "decode")

    # Cache contents should also match (modulo the layout transpose).
    assert jnp.allclose(jnp.transpose(cache_k, (0, 2, 1, 3)), ref_ck, atol=2e-3)
    assert jnp.allclose(jnp.transpose(cache_v, (0, 2, 1, 3)), ref_cv, atol=2e-3)

    print("KERNEL_OK")
</pallas_src>

<mosaic_0001>
module attributes {stable_mosaic.version = 11 : i64} {
  func.func @_matmul_kernel(%arg0: i32, %arg1: i32, %arg2: i32, %arg3: memref<16x32xf32, #tpu.memory_space<vmem>>, %arg4: memref<32x64xf32, #tpu.memory_space<vmem>>, %arg5: memref<16x64xf32, #tpu.memory_space<vmem>>, %arg6: memref<16x64xf32, #tpu.memory_space<vmem>>) attributes {dimension_semantics = [#tpu.dimension_semantics<parallel>, #tpu.dimension_semantics<parallel>, #tpu.dimension_semantics<arbitrary>], iteration_bounds = array<i64: 1, 1, 1>, scalar_prefetch = 0 : i64, scratch_operands = 1 : i64, tpu.core_type = #tpu.core_type<tc>, window_params = [{transform_indices = @transform_0, window_bounds = array<i64: 16, 32>}, {transform_indices = @transform_1, window_bounds = array<i64: 32, 64>}, {transform_indices = @transform_2, window_bounds = array<i64: 16, 64>}]} {
    %c0_i32 = arith.constant 0 : i32
    %0 = arith.cmpi eq, %arg2, %c0_i32 : i32
    %1 = arith.extui %0 : i1 to i32
    %c0_i32_0 = arith.constant 0 : i32
    %2 = arith.cmpi ne, %1, %c0_i32_0 : i32
    scf.if %2 {
      %cst_10 = arith.constant 0.000000e+00 : f32
      %12 = vector.broadcast %cst_10 : f32 to vector<16x64xf32>
      %c0_11 = arith.constant 0 : index
      %c0_12 = arith.constant 0 : index
      %13 = vector.load %arg6[%c0_11, %c0_12] : memref<16x64xf32, #tpu.memory_space<vmem>>, vector<16x64xf32>
      tpu.vector_store %arg6[%c0_11, %c0_12], %12 {strides = array<i32>} : memref<16x64xf32, #tpu.memory_space<vmem>>, vector<16x64xf32>,
    } else {
    }
    %c0 = arith.constant 0 : index
    %c0_1 = arith.constant 0 : index
    %3 = vector.load %arg6[%c0, %c0_1] : memref<16x64xf32, #tpu.memory_space<vmem>>, vector<16x64xf32>
    %c0_2 = arith.constant 0 : index
    %c0_3 = arith.constant 0 : index
    %4 = vector.load %arg3[%c0_2, %c0_3] : memref<16x32xf32, #tpu.memory_space<vmem>>, vector<16x32xf32>
    %c0_4 = arith.constant 0 : index
    %c0_5 = arith.constant 0 : index
    %5 = vector.load %arg4[%c0_4, %c0_5] : memref<32x64xf32, #tpu.memory_space<vmem>>, vector<32x64xf32>
    %cst = arith.constant dense<0.000000e+00> : vector<16x64xf32>
    %6 = tpu.matmul %4, %5, %cst {dimension_numbers = #tpu.dot_dimension_numbers<[1], [0], [0], [1], [0, 0, 1, 1], [], []>} : vector<16x32xf32>, vector<32x64xf32>, vector<16x64xf32> -> vector<16x64xf32>
    %7 = arith.addf %3, %6 : vector<16x64xf32>
    %c0_6 = arith.constant 0 : index
    %c0_7 = arith.constant 0 : index
    %8 = vector.load %arg6[%c0_6, %c0_7] : memref<16x64xf32, #tpu.memory_space<vmem>>, vector<16x64xf32>
    tpu.vector_store %arg6[%c0_6, %c0_7], %7 {strides = array<i32>} : memref<16x64xf32, #tpu.memory_space<vmem>>, vector<16x64xf32>,
    %c0_i32_8 = arith.constant 0 : i32
    %9 = arith.cmpi eq, %arg2, %c0_i32_8 : i32
    %10 = arith.extui %9 : i1 to i32
    %c0_i32_9 = arith.constant 0 : i32
    %11 = arith.cmpi ne, %10, %c0_i32_9 : i32
    scf.if %11 {
      %c0_10 = arith.constant 0 : index
      %c0_11 = arith.constant 0 : index
      %12 = vector.load %arg6[%c0_10, %c0_11] : memref<16x64xf32, #tpu.memory_space<vmem>>, vector<16x64xf32>
      %c0_12 = arith.constant 0 : index
      %c0_13 = arith.constant 0 : index
      %13 = vector.load %arg5[%c0_12, %c0_13] : memref<16x64xf32, #tpu.memory_space<vmem>>, vector<16x64xf32>
      tpu.vector_store %arg5[%c0_12, %c0_13], %12 {strides = array<i32>} : memref<16x64xf32, #tpu.memory_space<vmem>>, vector<16x64xf32>,
    } else {
    }
    return
  }
  func.func @transform_0(%arg0: i32, %arg1: i32, %arg2: i32) -> (i32, i32) {
    %c0_i32 = arith.constant 0 : i32
    return %arg0, %arg2 : i32, i32
  }
  func.func @transform_1(%arg0: i32, %arg1: i32, %arg2: i32) -> (i32, i32) {
    %c0_i32 = arith.constant 0 : i32
    return %arg2, %arg1 : i32, i32
  }
  func.func @transform_2(%arg0: i32, %arg1: i32, %arg2: i32) -> (i32, i32) {
    %c0_i32 = arith.constant 0 : i32
    return %arg0, %arg1 : i32, i32
  }
}

</mosaic_0001>

<bundles_post_ra>
// kernel: tpu_custom_call.1
= control target key start
LH: loop header
LB: loop body
LE: loop exit
PB: predicated region body
PF: predicated region fallthrough
CT: control target
= control target key end

     0   :  { %7 = vsyncpa [#allocation4], 0  ;;  %s305_s0 = inlined_call_operand.hbm [shape: f32[16,32], index: 0, kind: input, shape index: {}]   ;;  %s306_s1 = inlined_call_operand.hbm [shape: f32[32,64], index: 1, kind: input, shape index: {}]   ;;  %s307_s2 = inlined_call_operand.hbm [shape: f32[16,64], index: 2, kind: output, shape index: {}]  }
   0x1   :  { %8 = vsyncpa [#allocation7], 0 }
   0x2   :  { %9 = vsyncpa [#allocation5], 0  ;;  %s258_s9 = smov [#allocation3]  }
   0x3   :  { %s15_s10 = sshll.u32 %s258_s9, 4  ;;  %s16_s10 = int_to_ptr.vmem [resolvable:$true] %s15_s10 }
   0x4   :  { %s200_s11 = scalar_lea.vmem %s16_s10, 256  ;;  %p205_p1 = scmp.lt.s32.totalorder %s16_s10, %s16_s10 }
   0x5   :  { %p201_p0 = scmp.ne.s32.totalorder %s16_s10, %s200_s11  ;;  %p206_p2 = scmp.lt.s32.totalorder %s200_s11, %s200_s11 }
   0x7   :  { %p207_p3 = por %p206_p2, %p205_p1 }
   0x9   :  { %p208_p4 = pnand %p207_p3, %p201_p0 }
   0xb   :  { %211 = shalt.err (!%p208_p4)
}
   0xc   :  { %s259_s12 = smov 128   ;;  %s260_s13 = smov 8  }
   0xd   :  { %21 = dma.hbm_to_vmem [thread:$0]  %s305_s0, 256, %s16_s10, [#allocation4], %s259_s12, %s259_s12, %s260_s13  }
   0xe   :  { %s261_s16 = smov [#allocation6]  }
   0xf   :  { %s27_s17 = sshll.u32 %s261_s16, 4  ;;  %s28_s17 = int_to_ptr.vmem [resolvable:$true] %s27_s17 }
  0x10   :  { %s220_s18 = scalar_lea.vmem %s28_s17, 512  ;;  %p225_p6 = scmp.lt.s32.totalorder %s28_s17, %s28_s17 }
  0x11   :  { %p221_p5 = scmp.ne.s32.totalorder %s28_s17, %s220_s18  ;;  %p226_p7 = scmp.lt.s32.totalorder %s220_s18, %s220_s18 }
  0x13   :  { %p227_p8 = por %p226_p7, %p225_p6 }
  0x15   :  { %p228_p9 = pnand %p227_p8, %p221_p5 }
  0x17   :  { %231 = shalt.err (!%p228_p9)
}
  0x18   :  { %33 = dma.hbm_to_vmem [thread:$0]  %s306_s1, 512, %s28_s17, [#allocation7], %s259_s12, %s259_s12, %s260_s13  }
  0x19   :  { %252 = dma.done.wait [#allocation4], 256  }
  0x1a   :  { %253 = vsyncadd [#allocation4], 4294967040 }
  0x1b   :  { %254 = dma.done.wait [#allocation7], 512  }
  0x1c   :  { %255 = vsyncadd [#allocation7], 4294966784  ;;  %vm44_vm0 = vcmask 523264   ;;  %v262_v0 = vmov 0.0   ;;  %vm55_vm1 = vcmask 261120   ;;  %v54_v1 = vld [vmem:[#allocation6 + $0x18] sm:$0xff] }
  0x1d   :  { %46 = vst.msk [vmem:[#allocation2 + $0x8] sm:$0xff] %vm44_vm0, %v262_v0  ;;  %45 = vst.msk [vmem:[#allocation2] sm:$0xff] %vm44_vm0, %v262_v0  ;;  %v53_v2 = vld [vmem:[#allocation6 + $0x10] sm:$0xff]  ;;  %175 = vmatprep.subr.mxu0 %v54_v1  ;;  %v52_v4 = vld [vmem:[#allocation6 + $0x8] sm:$0xff]  ;;  %s263_s0 = smov [#allocation8]  }
  0x1e   :  { %v49_v3 = vld [vmem:[#allocation3] sm:$0xff]  ;;  %176 = vmatpush3.msra.mxu0 %v54_v1  ;;  %v51_v5 = vld [vmem:[#allocation6] sm:$0xff]  ;;  %v50_v6 = vld [vmem:[#allocation3 + $0x8] sm:$0xff]  ;;  %s154_s1 = sshll.u32 %s263_s0, 4  ;;  %s155_s1 = int_to_ptr.vmem [resolvable:$true] %s154_s1 }
  0x1f   :  { %183 = vmatprep.mubr.msk.f32.mxu0 %vm55_vm1, %v49_v3  ;;  %177 = vmatprep.subr.mxu0 %v53_v2  ;;  %s232_s21 = scalar_lea.vmem %s155_s1, 256  ;;  %p237_p11 = scmp.lt.s32.totalorder %s155_s1, %s155_s1 }
  0x20   :  { %178 = vmatpush3.msra.mxu0 %v53_v2  ;;  %p233_p10 = scmp.ne.s32.totalorder %s155_s1, %s232_s21  ;;  %p238_p12 = scmp.lt.s32.totalorder %s232_s21, %s232_s21 }
  0x21   :  { %179 = vmatprep.subr.mxu0 %v52_v4 }
  0x22   :  { %180 = vmatpush3.msra.mxu0 %v52_v4  ;;  %p239_p13 = por %p238_p12, %p237_p11 }
  0x23   :  { %181 = vmatprep.subr.mxu0 %v51_v5 }
  0x24   :  { %182 = vmatpush3.msra.mxu0 %v51_v5  ;;  %v48_v7 = vld [vmem:[#allocation2 + $0x8] sm:$0xff]  ;;  %v47_v9 = vld [vmem:[#allocation2] sm:$0xff]  ;;  %p240_p0 = pnand %p239_p13, %p233_p10 }
  0x25   :  { %184 = vmatmul.mubr.msk.f32.vlgmr.msra.gmra.mxu0 %vm55_vm1, %v50_v6 }
  0xe5   :  { %v185_v8 = vpop.f32.mrf.mxu0 }
  0xe6   :  { %v138_v10 = vadd.f32 %v185_v8, %v48_v7 }
  0xe7   :  { %v128_v11 = vpop.f32.mrf.mxu0 }
  0xe8   :  { %141 = vst.msk [vmem:[#allocation2 + $0x8] sm:$0xff] %vm44_vm0, %v138_v10  ;;  %v137_v12 = vadd.f32 %v128_v11, %v47_v9 }
  0xea   :  { %140 = vst.msk [vmem:[#allocation2] sm:$0xff] %vm44_vm0, %v137_v12 }
  0xef   :  { %v146_v13 = vld [vmem:[#allocation2 + $0x8] sm:$0xff] }
  0xf0   :  { %148 = vst.msk [vmem:[#allocation8 + $0x8] sm:$0xff] %vm44_vm0, %v146_v13 }
  0xf1   :  { %v145_v14 = vld [vmem:[#allocation2] sm:$0xff] }
  0xf2   :  { %147 = vst.msk [vmem:[#allocation8] sm:$0xff] %vm44_vm0, %v145_v14 }
  0xf3   :  { %243 = shalt.err (!%p240_p0)
}
  0xf4   :  { %160 = dma.vmem_to_hbm [thread:$0]  %s155_s1, 256, %s307_s2, [#allocation5], %s259_s12, %s259_s12, %s260_s13  }
  0xf5   :  { %256 = dma.done.wait [#allocation5], 256  }
  0xf6   :  { %257 = vsyncadd [#allocation5], 4294967040 }
  0xf7   :  { %164 = vsyncpa [#allocation4], 1 }
  0xf8   :  { %165 = vsyncpa [#allocation7], 1 }
  0xf9   :  { %166 = vsyncpa [#allocation5], 1 }

</bundles_post_ra>
